<compile_context>
chip_gen: v6e
topology: v6e:2x2x1
jax: 0.10.0
libtpu: 0.0.40
codegen_flags: <defaults>
</compile_context>

<pallas_src>
import functools
import math

import jax
import jax.numpy as jnp
from jax.experimental import pallas as pl
from jax.experimental.pallas import tpu as pltpu

# ---- model hyper-parameters (standard DeepTTE config) ----------------------
NUM_FINAL_FCS = 3          # num_final_fcs
HIDDEN        = 128        # final_fc_size (EntireEstimator hidden)
ATTR_SIZE     = 28         # attr_net.out_size()
ATTR_PAD      = 32         # attr padded to a clean sublane multiple
SPTM_SIZE     = 128        # spatio_net.out_size()
LOCAL_IN      = 128        # LocalEstimator input_size
LOCAL_H1      = 64
LOCAL_H2      = 32
LANE          = 128        # TPU lane width
LEAKY_SLOPE   = 0.01       # F.leaky_relu default negative_slope
MAX_LOCAL_TILE = 2048      # rows of packed local sequence per grid step

# rows of the packed (16, 128) f32 constant holding biases + projection vectors
ROW_B_IN, ROW_BR0, ROW_BR1, ROW_BR2 = 0, 1, 2, 3
ROW_B1, ROW_B2 = 4, 5
ROW_W_OUT, ROW_W3 = 6, 7
ROW_B_OUT, ROW_B3 = 8, 9
VEC_ROWS = 16


def _round_up(x, m):
    return ((x + m - 1) // m) * m


def _cdiv(a, b):
    return -(-a // b)


# ---------------------------------------------------------------------------
# Fused kernel: one grid step handles
#   Entire head : one tile of trips (tile_e rows), skipped on padding-only steps
#   Local head  : one tile of packed sequence rows (tile_l rows)
# ---------------------------------------------------------------------------
def _deeptte_heads_kernel(attr_ref, sptm_t_ref, sptm_s_ref,
                          w_in_attr_ref, w_in_sptm_ref, w_res_ref,
                          w1_ref, w2_ref, vec_ref,
                          entire_out_ref, local_out_ref,
                          *, batch, tile_e):
    f32 = jnp.float32
    bf16 = jnp.bfloat16
    vec = vec_ref[...]                      # (16, 128) f32, VMEM-resident

    step = pl.program_id(0)

    # ---- EntireEstimator: only on steps that own real trips ---------------
    # (torch.cat((attr_t, sptm_t), 1) @ W_in) is computed as a split matmul:
    # attr @ W_in[:28] + sptm_t @ W_in[28:], both tile-aligned, no concat copy.
    @pl.when(step * tile_e < batch)
    def _entire():
        hidden = (jnp.dot(attr_ref[...].astype(bf16), w_in_attr_ref[...],
                          preferred_element_type=f32)
                  + jnp.dot(sptm_t_ref[...].astype(bf16), w_in_sptm_ref[...],
                            preferred_element_type=f32)
                  + vec[ROW_B_IN:ROW_B_IN + 1, :])
        w_res = w_res_ref[...]                               # (3,128,128) bf16
        for i in range(NUM_FINAL_FCS):
            residual = jnp.maximum(
                jnp.dot(hidden.astype(bf16), w_res[i],
                        preferred_element_type=f32)
                + vec[ROW_BR0 + i:ROW_BR0 + i + 1, :], 0.0)
            hidden = hidden + residual
        # final 128 -> 1 projection on VPU mul + lane reduce (keeps MXU free)
        e_col = jnp.sum(hidden * vec[ROW_W_OUT:ROW_W_OUT + 1, :],
                        axis=-1, keepdims=True)              # (tile_e, 1)
        entire_out_ref[...] = e_col + vec[ROW_B_OUT:ROW_B_OUT + 1, 0:1]

    @pl.when(step * tile_e >= batch)
    def _entire_padding():
        # padding-only step: deterministic zeros (sliced away by the wrapper)
        entire_out_ref[...] = jnp.zeros_like(entire_out_ref)

    # ---- LocalEstimator (hidden widths 64/32 zero-padded to 128 lanes) ----
    h = (jnp.dot(sptm_s_ref[...].astype(bf16), w1_ref[...],
                 preferred_element_type=f32)
         + vec[ROW_B1:ROW_B1 + 1, :])
    h = jnp.where(h > 0, h, LEAKY_SLOPE * h)                 # leaky_relu
    h = (jnp.dot(h.astype(bf16), w2_ref[...], preferred_element_type=f32)
         + vec[ROW_B2:ROW_B2 + 1, :])
    h = jnp.where(h > 0, h, LEAKY_SLOPE * h)
    l_col = jnp.sum(h * vec[ROW_W3:ROW_W3 + 1, :], axis=-1, keepdims=True)
    local_out_ref[...] = l_col + vec[ROW_B3:ROW_B3 + 1, 0:1]


# ---------------------------------------------------------------------------
# wrapper: build the grid, no padding of the large local input, thin outputs.
# ---------------------------------------------------------------------------
_WEIGHT_ORDER = ("w_in_attr", "w_in_sptm", "w_res", "w1", "w2", "vec")


def deeptte_heads_forward(attr_t, sptm_t, sptm_s_data, kparams):
    B = attr_t.shape[0]
    N = sptm_s_data.shape[0]

    # Local-head tiling: big tiles to amortize per-step overhead; keep >= 2
    # grid steps when possible so v7x's two TensorCores both get work.
    target = max(_cdiv(N, 2), 8)
    gran = LANE if N >= 2 * LANE else 8
    tile_l = min(MAX_LOCAL_TILE, _round_up(target, gran))
    num_tiles = max(1, _cdiv(N, tile_l))

    # Entire-head trips are distributed over the same grid; steps whose slice
    # is all padding skip the compute (pl.when) and write zeros.
    tile_e = _round_up(_cdiv(B, num_tiles), 8)
    e_blocks = max(1, _cdiv(B, tile_e))

    # only the tiny attr input is padded (28 -> 32 cols); the big N x 128
    # local input is passed unpadded (ragged last block handled by Pallas).
    attr_p = jnp.pad(attr_t, ((0, 0), (0, ATTR_PAD - ATTR_SIZE)))

    weights = [kparams[k] for k in _WEIGHT_ORDER]

    def const_spec(shape):
        nd = len(shape)
        return pl.BlockSpec(shape, lambda i, _n=nd: (0,) * _n)

    def clamped_row_spec(tile, width):
        # entire-head inputs: clamp so padding-only steps re-read a valid
        # (tiny) block instead of indexing past the array.
        return pl.BlockSpec((tile, width),
                            lambda i: (jnp.minimum(i, e_blocks - 1), 0))

    in_specs = ([clamped_row_spec(tile_e, ATTR_PAD),
                 clamped_row_spec(tile_e, SPTM_SIZE),
                 pl.BlockSpec((tile_l, LOCAL_IN), lambda i: (i, 0))]
                + [const_spec(tuple(w.shape)) for w in weights])

    # thin column outputs: per-step block is a contiguous (rows, 1) slab.
    out_specs = (pl.BlockSpec((None, tile_e, 1), lambda i: (i, 0, 0)),
                 pl.BlockSpec((None, tile_l, 1), lambda i: (i, 0, 0)))
    out_shape = (jax.ShapeDtypeStruct((num_tiles, tile_e, 1), jnp.float32),
                 jax.ShapeDtypeStruct((num_tiles, tile_l, 1), jnp.float32))

    kernel = functools.partial(_deeptte_heads_kernel, batch=B, tile_e=tile_e)

    # advisory cost estimate so XLA can schedule around the call
    flops = (2 * B * ((ATTR_PAD + SPTM_SIZE) * HIDDEN
                      + NUM_FINAL_FCS * HIDDEN * HIDDEN + HIDDEN)
             + 2 * N * (2 * LANE * LANE + LANE))
    w_bytes = sum(int(w.size) * w.dtype.itemsize for w in weights)
    bytes_accessed = (4 * (B * (ATTR_PAD + SPTM_SIZE) + N * LOCAL_IN
                           + num_tiles * (tile_e + tile_l)) + w_bytes)
    cost = pl.CostEstimate(flops=flops, transcendentals=0,
                           bytes_accessed=bytes_accessed)

    e_mat, l_mat = pl.pallas_call(
        kernel,
        out_shape=out_shape,
        grid_spec=pltpu.PrefetchScalarGridSpec(
            num_scalar_prefetch=0,
            grid=(num_tiles,),
            in_specs=in_specs,
            out_specs=out_specs),
        compiler_params=pltpu.CompilerParams(
            dimension_semantics=("parallel",)),
        cost_estimate=cost,
    )(attr_p, sptm_t, sptm_s_data, *weights)

    entire_out = e_mat.reshape(-1)[:B].reshape(B, 1)
    local_out = l_mat.reshape(-1)[:N].reshape(N, 1)
    return entire_out, local_out


def deeptte_forward(attr_t, sptm_s_data, sptm_l, sptm_t, params, training=True):
    """DeepTTE_Net.forward given the spatio/attr component outputs."""
    entire_out, local_out = deeptte_heads_forward(
        attr_t, sptm_t, sptm_s_data, params["kernel"])
    if training:
        return entire_out, (local_out, sptm_l)
    # eval mode only needs the entire head (local result is discarded).
    return entire_out


# ---------------------------------------------------------------------------
# parameter init (xavier_uniform weights, zero biases) + kernel-layout prep
# ---------------------------------------------------------------------------
def xavier_uniform(key, fan_in, fan_out):
    bound = math.sqrt(6.0 / (fan_in + fan_out))
    return jax.random.uniform(key, (fan_in, fan_out), jnp.float32, -bound, bound)


def make_kernel_params(entire, local):
    """Pad / pack / pre-cast weights into lane-aligned kernel form."""
    bf16 = jnp.bfloat16

    def pad2(w, rows, cols):
        return jnp.pad(w, ((0, rows - w.shape[0]), (0, cols - w.shape[1])))

    vec = jnp.zeros((VEC_ROWS, LANE), jnp.float32)
    vec = vec.at[ROW_B_IN].set(entire["b_in"][0])
    for i in range(NUM_FINAL_FCS):
        vec = vec.at[ROW_BR0 + i].set(entire["b_res"][i, 0])
    vec = vec.at[ROW_B1, :LOCAL_H1].set(local["b1"][0])
    vec = vec.at[ROW_B2, :LOCAL_H2].set(local["b2"][0])
    vec = vec.at[ROW_W_OUT].set(entire["w_out"][:, 0])
    vec = vec.at[ROW_W3, :LOCAL_H2].set(local["w3"][:, 0])
    vec = vec.at[ROW_B_OUT, :].set(entire["b_out"][0, 0])
    vec = vec.at[ROW_B3, :].set(local["b3"][0, 0])

    return {
        # matmul weight matrices pre-cast to bf16 (f32 accumulation in-kernel)
        "w_in_attr": pad2(entire["w_in"][:ATTR_SIZE], ATTR_PAD, LANE).astype(bf16),
        "w_in_sptm": entire["w_in"][ATTR_SIZE:].astype(bf16),   # (128, 128)
        "w_res":     entire["w_res"].astype(bf16),              # (3, 128, 128)
        "w1":        pad2(local["w1"], LOCAL_IN, LANE).astype(bf16),
        "w2":        pad2(local["w2"], LANE, LANE).astype(bf16),
        # packed f32 bias rows + output-projection vectors
        "vec":       vec,
    }


def init_params(key):
    keys = jax.random.split(key, 8)
    in_size = ATTR_SIZE + SPTM_SIZE
    entire = {
        "w_in":  xavier_uniform(keys[0], in_size, HIDDEN),
        "b_in":  jnp.zeros((1, HIDDEN), jnp.float32),
        "w_res": jnp.stack(
            [xavier_uniform(jax.random.fold_in(keys[1], i), HIDDEN, HIDDEN)
             for i in range(NUM_FINAL_FCS)], axis=0),
        "b_res": jnp.zeros((NUM_FINAL_FCS, 1, HIDDEN), jnp.float32),
        "w_out": xavier_uniform(keys[2], HIDDEN, 1),
        "b_out": jnp.zeros((1, 1), jnp.float32),
    }
    local = {
        "w1": xavier_uniform(keys[3], LOCAL_IN, LOCAL_H1),
        "b1": jnp.zeros((1, LOCAL_H1), jnp.float32),
        "w2": xavier_uniform(keys[4], LOCAL_H1, LOCAL_H2),
        "b2": jnp.zeros((1, LOCAL_H2), jnp.float32),
        "w3": xavier_uniform(keys[5], LOCAL_H2, 1),
        "b3": jnp.zeros((1, 1), jnp.float32),
    }
    return {"entire": entire, "local": local,
            "kernel": make_kernel_params(entire, local)}


# ---------------------------------------------------------------------------
# pure-JAX references
#   *_ref      : original PyTorch semantics at full f32 precision
#   *_ref_bf16 : same math with the kernel's bf16-operand / f32-accum matmuls
# ---------------------------------------------------------------------------
def _hi_dot(a, b):
    return jnp.dot(a, b, precision=jax.lax.Precision.HIGHEST)


def _bf_dot(a, b):
    return jnp.dot(a.astype(jnp.bfloat16), b.astype(jnp.bfloat16),
                   preferred_element_type=jnp.float32)


def entire_ref(attr_t, sptm_t, p):
    h = _hi_dot(jnp.concatenate([attr_t, sptm_t], axis=1), p["w_in"]) + p["b_in"]
    for i in range(NUM_FINAL_FCS):
        h = h + jnp.maximum(_hi_dot(h, p["w_res"][i]) + p["b_res"][i], 0.0)
    return _hi_dot(h, p["w_out"]) + p["b_out"]


def local_ref(x, p):
    def lrelu(v):
        return jnp.where(v > 0, v, LEAKY_SLOPE * v)
    h = lrelu(_hi_dot(x, p["w1"]) + p["b1"])
    h = lrelu(_hi_dot(h, p["w2"]) + p["b2"])
    return _hi_dot(h, p["w3"]) + p["b3"]


def entire_ref_bf16(attr_t, sptm_t, p):
    h = (_bf_dot(attr_t, p["w_in"][:ATTR_SIZE])
         + _bf_dot(sptm_t, p["w_in"][ATTR_SIZE:]) + p["b_in"])
    for i in range(NUM_FINAL_FCS):
        h = h + jnp.maximum(_bf_dot(h, p["w_res"][i]) + p["b_res"][i], 0.0)
    return jnp.sum(h * p["w_out"][:, 0], axis=-1, keepdims=True) + p["b_out"]


def local_ref_bf16(x, p):
    def lrelu(v):
        return jnp.where(v > 0, v, LEAKY_SLOPE * v)
    h = lrelu(_bf_dot(x, p["w1"]) + p["b1"])
    h = lrelu(_bf_dot(h, p["w2"]) + p["b2"])
    return jnp.sum(h * p["w3"][:, 0], axis=-1, keepdims=True) + p["b3"]


if __name__ == "__main__":
    key = jax.random.PRNGKey(0)
    k_attr, k_sptm_t, k_sptm_s, k_params = jax.random.split(key, 4)

    B = 2          # batch (number of trips)
    N_PACKED = 16  # total rows of packed local sequence (sptm_s[0].shape[0])

    attr_t = jax.random.normal(k_attr, (B, ATTR_SIZE), jnp.float32)
    sptm_t = jax.random.normal(k_sptm_t, (B, SPTM_SIZE), jnp.float32)
    sptm_s_data = jax.random.normal(k_sptm_s, (N_PACKED, LOCAL_IN), jnp.float32)
    sptm_l = jnp.array([8, 8], jnp.int32)  # per-sequence lengths (metadata only)

    params = init_params(k_params)

    entire_out, (local_out, lens) = deeptte_forward(
        attr_t, sptm_s_data, sptm_l, sptm_t, params, training=True)
    jax.block_until_ready((entire_out, local_out))
    assert entire_out.shape == (B, 1) and local_out.shape == (N_PACKED, 1)

    # exact-semantics check vs a pure-JAX model using the same bf16-operand /
    # f32-accumulate matmul numerics as the kernel
    e_bf = entire_ref_bf16(attr_t, sptm_t, params["entire"])
    l_bf = local_ref_bf16(sptm_s_data, params["local"])
    assert jnp.allclose(entire_out, e_bf, atol=2e-3, rtol=2e-3), (
        float(jnp.max(jnp.abs(entire_out - e_bf))))
    assert jnp.allclose(local_out, l_bf, atol=2e-3, rtol=2e-3), (
        float(jnp.max(jnp.abs(local_out - l_bf))))

    # sanity check vs the full-f32 reference (tolerance sized for bf16 matmuls)
    e_ref = entire_ref(attr_t, sptm_t, params["entire"])
    l_ref = local_ref(sptm_s_data, params["local"])
    assert jnp.allclose(entire_out, e_ref, atol=1e-1, rtol=1e-1), (
        float(jnp.max(jnp.abs(entire_out - e_ref))))
    assert jnp.allclose(local_out, l_ref, atol=1e-1, rtol=1e-1), (
        float(jnp.max(jnp.abs(local_out - l_ref))))

    print("KERNEL_OK")
</pallas_src>

<mosaic_0001>
module attributes {stable_mosaic.version = 11 : i64} {
  func.func @_deeptte_heads_kernel(%arg0: i32, %arg1: memref<8x32xf32, #tpu.memory_space<vmem>>, %arg2: memref<8x128xf32, #tpu.memory_space<vmem>>, %arg3: memref<8x128xf32, #tpu.memory_space<vmem>>, %arg4: memref<32x128xbf16, #tpu.memory_space<vmem>>, %arg5: memref<128x128xbf16, #tpu.memory_space<vmem>>, %arg6: memref<3x128x128xbf16, #tpu.memory_space<vmem>>, %arg7: memref<128x128xbf16, #tpu.memory_space<vmem>>, %arg8: memref<128x128xbf16, #tpu.memory_space<vmem>>, %arg9: memref<16x128xf32, #tpu.memory_space<vmem>>, %arg10: memref<1x8x1xf32, #tpu.memory_space<vmem>>, %arg11: memref<1x8x1xf32, #tpu.memory_space<vmem>>) attributes {dimension_semantics = [#tpu.dimension_semantics<parallel>], iteration_bounds = array<i64: 2>, scalar_prefetch = 0 : i64, scratch_operands = 0 : i64, tpu.core_type = #tpu.core_type<tc>, window_params = [{transform_indices = @transform_0, window_bounds = array<i64: 8, 32>}, {transform_indices = @transform_1, window_bounds = array<i64: 8, 128>}, {transform_indices = @transform_2, window_bounds = array<i64: 8, 128>}, {pipeline_mode = #tpu.pipeline_mode<synchronous>, transform_indices = @transform_3, window_bounds = array<i64: 32, 128>}, {pipeline_mode = #tpu.pipeline_mode<synchronous>, transform_indices = @transform_4, window_bounds = array<i64: 128, 128>}, {pipeline_mode = #tpu.pipeline_mode<synchronous>, transform_indices = @transform_5, window_bounds = array<i64: 3, 128, 128>}, {pipeline_mode = #tpu.pipeline_mode<synchronous>, transform_indices = @transform_6, window_bounds = array<i64: 128, 128>}, {pipeline_mode = #tpu.pipeline_mode<synchronous>, transform_indices = @transform_7, window_bounds = array<i64: 128, 128>}, {pipeline_mode = #tpu.pipeline_mode<synchronous>, transform_indices = @transform_8, window_bounds = array<i64: 16, 128>}, {transform_indices = @transform_9, window_bounds = array<i64: 1, 8, 1>}, {transform_indices = @transform_10, window_bounds = array<i64: 1, 8, 1>}]} {
    %c0 = arith.constant 0 : index
    %c0_0 = arith.constant 0 : index
    %0 = vector.load %arg9[%c0, %c0_0] : memref<16x128xf32, #tpu.memory_space<vmem>>, vector<16x128xf32>
    %c8_i32 = arith.constant 8 : i32
    %1 = arith.muli %arg0, %c8_i32 : i32
    %c2_i32 = arith.constant 2 : i32
    %2 = arith.cmpi slt, %1, %c2_i32 : i32
    %3 = arith.extui %2 : i1 to i32
    %c0_i32 = arith.constant 0 : i32
    %4 = arith.cmpi ne, %3, %c0_i32 : i32
    scf.if %4 {
      %c0_19 = arith.constant 0 : index
      %c0_20 = arith.constant 0 : index
      %43 = vector.load %arg1[%c0_19, %c0_20] : memref<8x32xf32, #tpu.memory_space<vmem>>, vector<8x32xf32>
      %44 = arith.truncf %43 : vector<8x32xf32> to vector<8x32xbf16>
      %c0_21 = arith.constant 0 : index
      %c0_22 = arith.constant 0 : index
      %45 = vector.load %arg4[%c0_21, %c0_22] : memref<32x128xbf16, #tpu.memory_space<vmem>>, vector<32x128xbf16>
      %cst_23 = arith.constant dense<0.000000e+00> : vector<8x128xf32>
      %46 = tpu.matmul %44, %45, %cst_23 {dimension_numbers = #tpu.dot_dimension_numbers<[1], [0], [0], [1], [0, 0, 1, 1], [], []>} : vector<8x32xbf16>, vector<32x128xbf16>, vector<8x128xf32> -> vector<8x128xf32>
      %c0_24 = arith.constant 0 : index
      %c0_25 = arith.constant 0 : index
      %47 = vector.load %arg2[%c0_24, %c0_25] : memref<8x128xf32, #tpu.memory_space<vmem>>, vector<8x128xf32>
      %48 = arith.truncf %47 : vector<8x128xf32> to vector<8x128xbf16>
      %c0_26 = arith.constant 0 : index
      %c0_27 = arith.constant 0 : index
      %49 = vector.load %arg5[%c0_26, %c0_27] : memref<128x128xbf16, #tpu.memory_space<vmem>>, vector<128x128xbf16>
      %cst_28 = arith.constant dense<0.000000e+00> : vector<8x128xf32>
      %50 = tpu.matmul %48, %49, %cst_28 {dimension_numbers = #tpu.dot_dimension_numbers<[1], [0], [0], [1], [0, 0, 1, 1], [], []>} : vector<8x128xbf16>, vector<128x128xbf16>, vector<8x128xf32> -> vector<8x128xf32>
      %51 = arith.addf %46, %50 : vector<8x128xf32>
      %52 = vector.extract_strided_slice %0 {offsets = [0, 0], sizes = [1, 128], strides = [1, 1]} : vector<16x128xf32> to vector<1x128xf32>
      %53 = vector.broadcast %52 : vector<1x128xf32> to vector<8x128xf32>
      %54 = arith.addf %51, %53 : vector<8x128xf32>
      %c0_29 = arith.constant 0 : index
      %c0_30 = arith.constant 0 : index
      %c0_31 = arith.constant 0 : index
      %55 = vector.load %arg6[%c0_29, %c0_30, %c0_31] : memref<3x128x128xbf16, #tpu.memory_space<vmem>>, vector<3x128x128xbf16>
      %56 = arith.truncf %54 : vector<8x128xf32> to vector<8x128xbf16>
      %57 = vector.extract_strided_slice %55 {offsets = [0, 0, 0], sizes = [1, 128, 128], strides = [1, 1, 1]} : vector<3x128x128xbf16> to vector<1x128x128xbf16>
      %58 = vector.shape_cast %57 : vector<1x128x128xbf16> to vector<128x128xbf16>
      %cst_32 = arith.constant dense<0.000000e+00> : vector<8x128xf32>
      %59 = tpu.matmul %56, %58, %cst_32 {dimension_numbers = #tpu.dot_dimension_numbers<[1], [0], [0], [1], [0, 0, 1, 1], [], []>} : vector<8x128xbf16>, vector<128x128xbf16>, vector<8x128xf32> -> vector<8x128xf32>
      %60 = vector.extract_strided_slice %0 {offsets = [1, 0], sizes = [1, 128], strides = [1, 1]} : vector<16x128xf32> to vector<1x128xf32>
      %61 = vector.broadcast %60 : vector<1x128xf32> to vector<8x128xf32>
      %62 = arith.addf %59, %61 : vector<8x128xf32>
      %cst_33 = arith.constant 0.000000e+00 : f32
      %63 = vector.broadcast %cst_33 : f32 to vector<8x128xf32>
      %64 = arith.maximumf %62, %63 : vector<8x128xf32>
      %65 = arith.addf %54, %64 : vector<8x128xf32>
      %66 = arith.truncf %65 : vector<8x128xf32> to vector<8x128xbf16>
      %67 = vector.extract_strided_slice %55 {offsets = [1, 0, 0], sizes = [1, 128, 128], strides = [1, 1, 1]} : vector<3x128x128xbf16> to vector<1x128x128xbf16>
      %68 = vector.shape_cast %67 : vector<1x128x128xbf16> to vector<128x128xbf16>
      %cst_34 = arith.constant dense<0.000000e+00> : vector<8x128xf32>
      %69 = tpu.matmul %66, %68, %cst_34 {dimension_numbers = #tpu.dot_dimension_numbers<[1], [0], [0], [1], [0, 0, 1, 1], [], []>} : vector<8x128xbf16>, vector<128x128xbf16>, vector<8x128xf32> -> vector<8x128xf32>
      %70 = vector.extract_strided_slice %0 {offsets = [2, 0], sizes = [1, 128], strides = [1, 1]} : vector<16x128xf32> to vector<1x128xf32>
      %71 = vector.broadcast %70 : vector<1x128xf32> to vector<8x128xf32>
      %72 = arith.addf %69, %71 : vector<8x128xf32>
      %cst_35 = arith.constant 0.000000e+00 : f32
      %73 = vector.broadcast %cst_35 : f32 to vector<8x128xf32>
      %74 = arith.maximumf %72, %73 : vector<8x128xf32>
      %75 = arith.addf %65, %74 : vector<8x128xf32>
      %76 = arith.truncf %75 : vector<8x128xf32> to vector<8x128xbf16>
      %77 = vector.extract_strided_slice %55 {offsets = [2, 0, 0], sizes = [1, 128, 128], strides = [1, 1, 1]} : vector<3x128x128xbf16> to vector<1x128x128xbf16>
      %78 = vector.shape_cast %77 : vector<1x128x128xbf16> to vector<128x128xbf16>
      %cst_36 = arith.constant dense<0.000000e+00> : vector<8x128xf32>
      %79 = tpu.matmul %76, %78, %cst_36 {dimension_numbers = #tpu.dot_dimension_numbers<[1], [0], [0], [1], [0, 0, 1, 1], [], []>} : vector<8x128xbf16>, vector<128x128xbf16>, vector<8x128xf32> -> vector<8x128xf32>
      %80 = vector.extract_strided_slice %0 {offsets = [3, 0], sizes = [1, 128], strides = [1, 1]} : vector<16x128xf32> to vector<1x128xf32>
      %81 = vector.broadcast %80 : vector<1x128xf32> to vector<8x128xf32>
      %82 = arith.addf %79, %81 : vector<8x128xf32>
      %cst_37 = arith.constant 0.000000e+00 : f32
      %83 = vector.broadcast %cst_37 : f32 to vector<8x128xf32>
      %84 = arith.maximumf %82, %83 : vector<8x128xf32>
      %85 = arith.addf %75, %84 : vector<8x128xf32>
      %86 = vector.extract_strided_slice %0 {offsets = [6, 0], sizes = [1, 128], strides = [1, 1]} : vector<16x128xf32> to vector<1x128xf32>
      %87 = vector.broadcast %86 : vector<1x128xf32> to vector<8x128xf32>
      %88 = arith.mulf %85, %87 : vector<8x128xf32>
      %cst_38 = arith.constant dense<0.000000e+00> : vector<8xf32>
      %89 = vector.multi_reduction <add>, %88, %cst_38 [1] : vector<8x128xf32> to vector<8xf32>
      %90 = vector.shape_cast %89 : vector<8xf32> to vector<8x1xf32>
      %91 = vector.extract_strided_slice %0 {offsets = [8, 0], sizes = [1, 1], strides = [1, 1]} : vector<16x128xf32> to vector<1x1xf32>
      %92 = vector.broadcast %91 : vector<1x1xf32> to vector<8x1xf32>
      %93 = arith.addf %90, %92 : vector<8x1xf32>
      %c0_39 = arith.constant 0 : index
      %c0_40 = arith.constant 0 : index
      %c0_41 = arith.constant 0 : index
      %94 = vector.load %arg10[%c0_39, %c0_40, %c0_41] : memref<1x8x1xf32, #tpu.memory_space<vmem>>, vector<1x8x1xf32>
      %95 = vector.shape_cast %94 : vector<1x8x1xf32> to vector<8x1xf32>
      %96 = vector.shape_cast %93 : vector<8x1xf32> to vector<1x8x1xf32>
      tpu.vector_store %arg10[%c0_39, %c0_40, %c0_41], %96 {strides = array<i32>} : memref<1x8x1xf32, #tpu.memory_space<vmem>>, vector<1x8x1xf32>,
    } else {
    }
    %c8_i32_1 = arith.constant 8 : i32
    %5 = arith.muli %arg0, %c8_i32_1 : i32
    %c2_i32_2 = arith.constant 2 : i32
    %6 = arith.cmpi sge, %5, %c2_i32_2 : i32
    %7 = arith.extui %6 : i1 to i32
    %c0_i32_3 = arith.constant 0 : i32
    %8 = arith.cmpi ne, %7, %c0_i32_3 : i32
    scf.if %8 {
      %cst_19 = arith.constant 0.000000e+00 : f32
      %43 = vector.broadcast %cst_19 : f32 to vector<8x1xf32>
      %c0_20 = arith.constant 0 : index
      %c0_21 = arith.constant 0 : index
      %c0_22 = arith.constant 0 : index
      %44 = vector.load %arg10[%c0_20, %c0_21, %c0_22] : memref<1x8x1xf32, #tpu.memory_space<vmem>>, vector<1x8x1xf32>
      %45 = vector.shape_cast %44 : vector<1x8x1xf32> to vector<8x1xf32>
      %46 = vector.shape_cast %43 : vector<8x1xf32> to vector<1x8x1xf32>
      tpu.vector_store %arg10[%c0_20, %c0_21, %c0_22], %46 {strides = array<i32>} : memref<1x8x1xf32, #tpu.memory_space<vmem>>, vector<1x8x1xf32>,
    } else {
    }
    %c0_4 = arith.constant 0 : index
    %c0_5 = arith.constant 0 : index
    %9 = vector.load %arg3[%c0_4, %c0_5] : memref<8x128xf32, #tpu.memory_space<vmem>>, vector<8x128xf32>
    %10 = arith.truncf %9 : vector<8x128xf32> to vector<8x128xbf16>
    %c0_6 = arith.constant 0 : index
    %c0_7 = arith.constant 0 : index
    %11 = vector.load %arg7[%c0_6, %c0_7] : memref<128x128xbf16, #tpu.memory_space<vmem>>, vector<128x128xbf16>
    %cst = arith.constant dense<0.000000e+00> : vector<8x128xf32>
    %12 = tpu.matmul %10, %11, %cst {dimension_numbers = #tpu.dot_dimension_numbers<[1], [0], [0], [1], [0, 0, 1, 1], [], []>} : vector<8x128xbf16>, vector<128x128xbf16>, vector<8x128xf32> -> vector<8x128xf32>
    %13 = vector.extract_strided_slice %0 {offsets = [4, 0], sizes = [1, 128], strides = [1, 1]} : vector<16x128xf32> to vector<1x128xf32>
    %14 = vector.broadcast %13 : vector<1x128xf32> to vector<8x128xf32>
    %15 = arith.addf %12, %14 : vector<8x128xf32>
    %cst_8 = arith.constant 0.000000e+00 : f32
    %16 = vector.broadcast %cst_8 : f32 to vector<8x128xf32>
    %17 = arith.cmpf ogt, %15, %16 : vector<8x128xf32>
    %cst_9 = arith.constant 0.00999999977 : f32
    %18 = vector.broadcast %cst_9 : f32 to vector<8x128xf32>
    %19 = arith.mulf %18, %15 : vector<8x128xf32>
    %20 = arith.select %17, %15, %19 : vector<8x128xi1>, vector<8x128xf32>
    %21 = arith.truncf %20 : vector<8x128xf32> to vector<8x128xbf16>
    %c0_10 = arith.constant 0 : index
    %c0_11 = arith.constant 0 : index
    %22 = vector.load %arg8[%c0_10, %c0_11] : memref<128x128xbf16, #tpu.memory_space<vmem>>, vector<128x128xbf16>
    %cst_12 = arith.constant dense<0.000000e+00> : vector<8x128xf32>
    %23 = tpu.matmul %21, %22, %cst_12 {dimension_numbers = #tpu.dot_dimension_numbers<[1], [0], [0], [1], [0, 0, 1, 1], [], []>} : vector<8x128xbf16>, vector<128x128xbf16>, vector<8x128xf32> -> vector<8x128xf32>
    %24 = vector.extract_strided_slice %0 {offsets = [5, 0], sizes = [1, 128], strides = [1, 1]} : vector<16x128xf32> to vector<1x128xf32>
    %25 = vector.broadcast %24 : vector<1x128xf32> to vector<8x128xf32>
    %26 = arith.addf %23, %25 : vector<8x128xf32>
    %cst_13 = arith.constant 0.000000e+00 : f32
    %27 = vector.broadcast %cst_13 : f32 to vector<8x128xf32>
    %28 = arith.cmpf ogt, %26, %27 : vector<8x128xf32>
    %cst_14 = arith.constant 0.00999999977 : f32
    %29 = vector.broadcast %cst_14 : f32 to vector<8x128xf32>
    %30 = arith.mulf %29, %26 : vector<8x128xf32>
    %31 = arith.select %28, %26, %30 : vector<8x128xi1>, vector<8x128xf32>
    %32 = vector.extract_strided_slice %0 {offsets = [7, 0], sizes = [1, 128], strides = [1, 1]} : vector<16x128xf32> to vector<1x128xf32>
    %33 = vector.broadcast %32 : vector<1x128xf32> to vector<8x128xf32>
    %34 = arith.mulf %31, %33 : vector<8x128xf32>
    %cst_15 = arith.constant dense<0.000000e+00> : vector<8xf32>
    %35 = vector.multi_reduction <add>, %34, %cst_15 [1] : vector<8x128xf32> to vector<8xf32>
    %36 = vector.shape_cast %35 : vector<8xf32> to vector<8x1xf32>
    %37 = vector.extract_strided_slice %0 {offsets = [9, 0], sizes = [1, 1], strides = [1, 1]} : vector<16x128xf32> to vector<1x1xf32>
    %38 = vector.broadcast %37 : vector<1x1xf32> to vector<8x1xf32>
    %39 = arith.addf %36, %38 : vector<8x1xf32>
    %c0_16 = arith.constant 0 : index
    %c0_17 = arith.constant 0 : index
    %c0_18 = arith.constant 0 : index
    %40 = vector.load %arg11[%c0_16, %c0_17, %c0_18] : memref<1x8x1xf32, #tpu.memory_space<vmem>>, vector<1x8x1xf32>
    %41 = vector.shape_cast %40 : vector<1x8x1xf32> to vector<8x1xf32>
    %42 = vector.shape_cast %39 : vector<8x1xf32> to vector<1x8x1xf32>
    tpu.vector_store %arg11[%c0_16, %c0_17, %c0_18], %42 {strides = array<i32>} : memref<1x8x1xf32, #tpu.memory_space<vmem>>, vector<1x8x1xf32>,
    return
  }
  func.func @transform_0(%arg0: i32) -> (i32, i32) {
    %c0_i32 = arith.constant 0 : i32
    %0 = arith.minsi %arg0, %c0_i32 : i32
    %c0_i32_0 = arith.constant 0 : i32
    %c0_i32_1 = arith.constant 0 : i32
    return %0, %c0_i32_0 : i32, i32
  }
  func.func @transform_1(%arg0: i32) -> (i32, i32) {
    %c0_i32 = arith.constant 0 : i32
    %0 = arith.minsi %arg0, %c0_i32 : i32
    %c0_i32_0 = arith.constant 0 : i32
    %c0_i32_1 = arith.constant 0 : i32
    return %0, %c0_i32_0 : i32, i32
  }
  func.func @transform_2(%arg0: i32) -> (i32, i32) {
    %c0_i32 = arith.constant 0 : i32
    %c0_i32_0 = arith.constant 0 : i32
    return %arg0, %c0_i32 : i32, i32
  }
  func.func @transform_3(%arg0: i32) -> (i32, i32) {
    %c0_i32 = arith.constant 0 : i32
    %c0_i32_0 = arith.constant 0 : i32
    %c0_i32_1 = arith.constant 0 : i32
    return %c0_i32, %c0_i32_0 : i32, i32
  }
  func.func @transform_4(%arg0: i32) -> (i32, i32) {
    %c0_i32 = arith.constant 0 : i32
    %c0_i32_0 = arith.constant 0 : i32
    %c0_i32_1 = arith.constant 0 : i32
    return %c0_i32, %c0_i32_0 : i32, i32
  }
  func.func @transform_5(%arg0: i32) -> (i32, i32, i32) {
    %c0_i32 = arith.constant 0 : i32
    %c0_i32_0 = arith.constant 0 : i32
    %c0_i32_1 = arith.constant 0 : i32
    %c0_i32_2 = arith.constant 0 : i32
    return %c0_i32, %c0_i32_0, %c0_i32_1 : i32, i32, i32
  }
  func.func @transform_6(%arg0: i32) -> (i32, i32) {
    %c0_i32 = arith.constant 0 : i32
    %c0_i32_0 = arith.constant 0 : i32
    %c0_i32_1 = arith.constant 0 : i32
    return %c0_i32, %c0_i32_0 : i32, i32
  }
  func.func @transform_7(%arg0: i32) -> (i32, i32) {
    %c0_i32 = arith.constant 0 : i32
    %c0_i32_0 = arith.constant 0 : i32
    %c0_i32_1 = arith.constant 0 : i32
    return %c0_i32, %c0_i32_0 : i32, i32
  }
  func.func @transform_8(%arg0: i32) -> (i32, i32) {
    %c0_i32 = arith.constant 0 : i32
    %c0_i32_0 = arith.constant 0 : i32
    %c0_i32_1 = arith.constant 0 : i32
    return %c0_i32, %c0_i32_0 : i32, i32
  }
  func.func @transform_9(%arg0: i32) -> (i32, i32, i32) {
    %c0_i32 = arith.constant 0 : i32
    %c0_i32_0 = arith.constant 0 : i32
    %c0_i32_1 = arith.constant 0 : i32
    return %arg0, %c0_i32, %c0_i32_0 : i32, i32, i32
  }
  func.func @transform_10(%arg0: i32) -> (i32, i32, i32) {
    %c0_i32 = arith.constant 0 : i32
    %c0_i32_0 = arith.constant 0 : i32
    %c0_i32_1 = arith.constant 0 : i32
    return %arg0, %c0_i32, %c0_i32_0 : i32, i32, i32
  }
}

</mosaic_0001>

<bundles_post_ra>
// kernel: tpu_custom_call.1
= control target key start
LH: loop header
LB: loop body
LE: loop exit
PB: predicated region body
PF: predicated region fallthrough
CT: control target
= control target key end

     0   :  { %s2849_s0 = inlined_call_operand.hbm [shape: f32[2,32], index: 0, kind: input, shape index: {}]   ;;  %s2850_s1 = inlined_call_operand.hbm [shape: f32[2,128], index: 1, kind: input, shape index: {}]   ;;  %s2851_s2 = inlined_call_operand.hbm [shape: f32[16,128], index: 2, kind: input, shape index: {}]   ;;  %s2852_s3 = inlined_call_operand.hbm [shape: bf16[32,128], index: 3, kind: input, shape index: {}]   ;;  %s2853_s4 = inlined_call_operand.hbm [shape: bf16[128,128], index: 4, kind: input, shape index: {}]   ;;  %s2854_s5 = inlined_call_operand.hbm [shape: bf16[3,128,128], index: 5, kind: input, shape index: {}]   ;;  %s2855_s6 = inlined_call_operand.hbm [shape: bf16[128,128], index: 6, kind: input, shape index: {}]   ;;  %s2856_s7 = inlined_call_operand.hbm [shape: bf16[128,128], index: 7, kind: input, shape index: {}]   ;;  %s2857_s8 = inlined_call_operand.hbm [shape: f32[16,128], index: 8, kind: input, shape index: {}]   ;;  %s2858_s9 = inlined_call_operand.vmem [shape: f32[2,8,1], index: 9, kind: output, shape index: {0}]   ;;  %s2859_s10 = inlined_call_operand.vmem [shape: f32[2,8,1], index: 10, kind: output, shape index: {1}]  }
   0x1   :  { %2868 = sst [smem:[#allocation26_spill]] %s2852_s3 }
   0x2   :  { %2869 = sst [smem:[#allocation27_spill]] %s2853_s4 }
   0x3   :  { %2870 = sst [smem:[#allocation28_spill]] %s2854_s5 }
   0x4   :  { %2871 = sst [smem:[#allocation29_spill]] %s2858_s9 }
   0x5   :  { %2872 = sst [smem:[#allocation30_spill]] %s2859_s10 }
   0x6   :  { %16 = vsyncpa [#allocation3], 0 }
   0x7   :  { %18 = vsyncpa [#allocation3 + $0x1], 0 }
   0x8   :  { %19 = vsyncpa [#allocation5], 0 }
   0x9   :  { %21 = vsyncpa [#allocation5 + $0x1], 0 }
   0xa   :  { %22 = vsyncpa [#allocation8], 0 }
   0xb   :  { %23 = vsyncpa [#allocation11], 0 }
   0xc   :  { %24 = vsyncpa [#allocation14], 0  ;;  %s2404_s13 = smov 0   ;;  %s2406_s14 = smov 0  }
   0xd   :  { %s2408_s15 = smov 0   ;;  %s2410_s16 = smov 0  }
   0xe   :  { %s2412_s17 = smov 0   ;;  %s2414_s18 = smov 0  }
   0xf   :  { %s2416_s19 = smov 0  }
  0x10 LB: > { %s2438_s20 = sadd.s32 4294967295, %s2325_s19   ;;  %s2441_s21 = sadd.s32 1, %s2325_s19   ;;  %s2325_s19 = sphi %s2416_s19, %s2899_s19   ;;  %s2321_s18 = sphi %s2414_s18, %s2907_s18   ;;  %s2317_s17 = sphi %s2412_s17, %s2906_s17   ;;  %s2313_s16 = sphi %s2410_s16, %s2905_s16   ;;  %s2309_s15 = sphi %s2408_s15, %s2904_s15   ;;  %s2305_s14 = sphi %s2406_s14, %s2903_s14   ;;  %s2301_s13 = sphi %s2404_s13, %s2902_s13  }
  0x11   : > { %2873 = sst [smem:[#allocation22_spill]] %s2441_s21  ;;  %p34_p0 = scmp.lt.s32.totalorder %s2325_s19, 0 }
  0x12   : > { %p36_p1 = scmp.lt.s32.totalorder %s2441_s21, 0  ;;  %s41_s22 = sadd.s32 1, %s2321_s18 }
  0x13   : > { %p48_p2 = scmp.ne.s32.totalorder %s2321_s18, %s2317_s17  ;;  %p49_p3 = scmp.eq.s32.totalorder %s2325_s19, 0 }
  0x14   : > { %s2449_s23 = scalar_select %p34_p0, %s2325_s19, 0 }
  0x15   : > { %s37_s24 = scalar_select %p36_p1, %s2441_s21, 0 }
  0x16   : > { %p54_p4 = scmp.ne.s32.totalorder %s2317_s17, %s2313_s16  ;;  %p2862_p5 = scmp.eq.s32.totalorder %s2438_s20, 0 }
  0x17   : > { %s38_s25 = ssub.s32 %s2449_s23, %s37_s24  ;;  %p2458_p7 = por %p49_p3, %p48_p2 }
  0x18   : > { %p39_p6 = scmp.eq.s32.totalorder %s38_s25, 0  ;;  %p2464_p8 = por %p2862_p5, %p54_p4 }
  0x19   : > { %s94_s28 = ssub.s32 %s2325_s19, %s2441_s21  ;;  %s97_s30 = sadd.s32 1, %s2309_s15 }
  0x1a   : > { %s2875_s27 = scalar_select %p2464_p8, 1, 0 }
  0x1b   : > { %s2471_s29 = scalar_select %p39_p6, %s2321_s18, %s41_s22  }
  0x1c   : > { %p95_p9 = scmp.eq.s32.totalorder %s94_s28, 0  ;;  %p104_p10 = scmp.ne.s32.totalorder %s2309_s15, %s2305_s14 }
  0x1d   : > { %2876 = sst [smem:[#allocation23_spill]] %s2471_s29  ;;  %p110_p11 = scmp.ne.s32.totalorder %s2305_s14, %s2301_s13 }
  0x1e   : > { %s2479_s11 = scalar_select %p95_p9, %s2309_s15, %s97_s30  }
  0x1f   : > { %p2483_p12 = por %p104_p10, %p49_p3  ;;  %p2489_p13 = por %p110_p11, %p2862_p5 }
  0x20   : > { %2877 = sst [smem:[#allocation24_spill]] %s2479_s11  ;;  %p1550_p0 = scmp.ge.s32.totalorder %s2325_s19, 1 }
  0x21   : > { %s2879_s16 = scalar_select %p2489_p13, 1, 0 }
  0x22   : > { %p299_p1 = scmp.lt.s32.totalorder %s2325_s19, 3  ;;  %s2327_s13 = smov [#allocation7]  }
  0x23   : > { %2880 = sst [smem:[#allocation25_spill]] %s2879_s16  ;;  %s311_s24 = sshll.u32 %s2327_s13, 4  ;;  %s312_s24 = int_to_ptr.vmem [resolvable:$true] %s311_s24 }
  0x24   : > { %p2495_p2 = pnand %p1550_p0, %p299_p1  ;;  %s2328_s28 = smov [#allocation10]  }
  0x25   : > { %s337_s30 = sshll.u32 %s2328_s28, 4  ;;  %s2329_s29 = smov [#allocation13]   ;;  %s2507_s30 = int_to_ptr.vmem [resolvable:$true] %s337_s30 }
  0x26   : > { %s2881_s22 = scalar_select %p2495_p2, 1, 0 }
  0x27   : > { %p1857_p3 = pneg %p2495_p2  ;;  %s363_s11 = sshll.u32 %s2329_s29, 4  ;;  %s2509_s11 = int_to_ptr.vmem [resolvable:$true] %s363_s11 }
  0x28   : > { %s2024_s21 = scalar_lea.vmem %s312_s24, 256  ;;  %p2032_p0 = scmp.lt.s32.totalorder %s312_s24, %s312_s24 }
  0x29   : > { %p2503_p4 = pnand %p1857_p3, %p2862_p5  ;;  %p2025_p9 = scmp.ne.s32.totalorder %s312_s24, %s2024_s21 }
  0x2a   : > { %p2033_p1 = scmp.lt.s32.totalorder %s2024_s21, %s2024_s21 }
  0x2b   : > { %p2513_p6 = pneg %p2503_p4 }
  0x2c   : > { %p2034_p3 = por %p2033_p1, %p2032_p0 }
  0x2d   : > { %p2027_p10 = pnand %p2025_p9, %p2513_p6 }
  0x2f   : > { %p2028_p11 = pneg %p2027_p10 }
  0x31   : > { %p2035_p5 = pnand %p2034_p3, %p2028_p11 }
  0x33   : > { %2038 = shalt.err (!%p2035_p5)
}
  0x34   : > { %s2330_s28 = smov 64   ;;  %s2331_s29 = smov 4  }
  0x35   : > { %s2884_s3 = sld [smem:[#allocation26_spill]]  ;;  %s2050_s16 = scalar_lea.vmem %s2507_s30, 3072 }
  0x36   : > { %p2051_p9 = scmp.ne.s32.totalorder %s2507_s30, %s2050_s16  ;;  %p2058_p11 = scmp.lt.s32.totalorder %s2507_s30, %s2507_s30 }
  0x37   : > { %p2059_p0 = scmp.lt.s32.totalorder %s2050_s16, %s2050_s16 }
  0x38   : > { %p2053_p10 = pnand %p2051_p9, %p2513_p6 }
  0x39   : > { %p2060_p1 = por %p2059_p0, %p2058_p11 }
  0x3a   : > { %p2054_p5 = pneg %p2053_p10 }
  0x3b   : > { %1860 = dma.hbm_to_vmem [thread:$0]  (!%p2503_p4), %s2884_s3, 256, %s312_s24, [#allocation8], %s2330_s28, %s2330_s28, %s2331_s29  }
  0x3c   : > { %p2061_p3 = pnand %p2060_p1, %p2054_p5 }
  0x3e   : > { %2064 = shalt.err (!%p2061_p3)
}
  0x3f   : > { %s2885_s5 = sld [smem:[#allocation28_spill]]  ;;  %s2076_s10 = scalar_lea.vmem %s2509_s11, 1024 }
  0x40   : > { %p2077_p9 = scmp.ne.s32.totalorder %s2509_s11, %s2076_s10  ;;  %p2084_p11 = scmp.lt.s32.totalorder %s2509_s11, %s2509_s11 }
  0x41   : > { %p2085_p0 = scmp.lt.s32.totalorder %s2076_s10, %s2076_s10 }
  0x42   : > { %p2079_p10 = pnand %p2077_p9, %p2513_p6 }
  0x43   : > { %p2086_p1 = por %p2085_p0, %p2084_p11 }
  0x44   : > { %p2080_p5 = pneg %p2079_p10 }
  0x45   : > { %1866 = dma.hbm_to_vmem [thread:$0]  (!%p2503_p4), %s2885_s5, 3072, %s2507_s30, [#allocation11], %s2330_s28, %s2330_s28, %s2331_s29  }
  0x46   : > { %p2087_p3 = pnand %p2086_p1, %p2080_p5 }
  0x48   : > { %2090 = shalt.err (!%p2087_p3)
}
  0x49   : > { %1872 = dma.hbm_to_vmem [thread:$0]  (!%p2503_p4), %s2856_s7, 1024, %s2509_s11, [#allocation14], %s2330_s28, %s2330_s28, %s2331_s29  }
  0x4a   : > { %s2332_s30 = smov [#allocation9]   ;;  %s2333_s9 = smov [#allocation12]  }
  0x4b   : > { %s324_s21 = sshll.u32 %s2332_s30, 4  ;;  %s350_s3 = sshll.u32 %s2333_s9, 4  ;;  %s325_s21 = int_to_ptr.vmem [resolvable:$true] %s324_s21  ;;  %s351_s3 = int_to_ptr.vmem [resolvable:$true] %s350_s3 }
  0x4c   : > { %s2102_s10 = scalar_lea.vmem %s325_s21, 1024  ;;  %p2110_p11 = scmp.lt.s32.totalorder %s325_s21, %s325_s21 }
  0x4d   : > { %p2103_p9 = scmp.ne.s32.totalorder %s325_s21, %s2102_s10  ;;  %p2111_p0 = scmp.lt.s32.totalorder %s2102_s10, %s2102_s10 }
  0x4f   : > { %p2105_p10 = pnand %p2103_p9, %p2513_p6  ;;  %p2112_p1 = por %p2111_p0, %p2110_p11 }
  0x51   : > { %p2106_p5 = pneg %p2105_p10 }
  0x53   : > { %p2113_p3 = pnand %p2112_p1, %p2106_p5 }
  0x55   : > { %2116 = shalt.err (!%p2113_p3)
}
  0x56   : > { %s2886_s4 = sld [smem:[#allocation27_spill]]  ;;  %s2128_s24 = scalar_lea.vmem %s351_s3, 1024 }
  0x57   : > { %p2129_p13 = scmp.ne.s32.totalorder %s351_s3, %s2128_s24  ;;  %p2136_p8 = scmp.lt.s32.totalorder %s351_s3, %s351_s3 }
  0x58   : > { %p2137_p2 = scmp.lt.s32.totalorder %s2128_s24, %s2128_s24 }
  0x59   : > { %p2131_p9 = pnand %p2129_p13, %p2513_p6 }
  0x5a   : > { %p2138_p11 = por %p2137_p2, %p2136_p8 }
  0x5b   : > { %p2132_p10 = pneg %p2131_p9 }
  0x5c   : > { %1863 = dma.hbm_to_vmem [thread:$0]  (!%p2503_p4), %s2886_s4, 1024, %s325_s21, [#allocation8], %s2330_s28, %s2330_s28, %s2331_s29  }
  0x5d   : > { %p2139_p5 = pnand %p2138_p11, %p2132_p10 }
  0x5f   : > { %2142 = shalt.err (!%p2139_p5)
}
  0x60   : > { %1869 = dma.hbm_to_vmem [thread:$0]  (!%p2503_p4), %s2855_s6, 1024, %s351_s3, [#allocation11], %s2330_s28, %s2330_s28, %s2331_s29  }
  0x61   : > { %s2334_s21 = smov [#allocation15]  }
  0x62   : > { %s376_s10 = sshll.u32 %s2334_s21, 4  ;;  %s377_s10 = int_to_ptr.vmem [resolvable:$true] %s376_s10 }
  0x63   : > { %s2154_s11 = scalar_lea.vmem %s377_s10, 256  ;;  %p2162_p2 = scmp.lt.s32.totalorder %s377_s10, %s377_s10 }
  0x64   : > { %p2155_p13 = scmp.ne.s32.totalorder %s377_s10, %s2154_s11  ;;  %p2163_p1 = scmp.lt.s32.totalorder %s2154_s11, %s2154_s11 }
  0x66   : > { %p2157_p0 = pnand %p2155_p13, %p2513_p6  ;;  %p2164_p3 = por %p2163_p1, %p2162_p2 }
  0x68   : > { %p2158_p8 = pneg %p2157_p0 }
  0x6a   : > { %p2165_p9 = pnand %p2164_p3, %p2158_p8 }
  0x6c   : > { %2168 = shalt.err (!%p2165_p9)
}
  0x6d   : > { %s2335_s16 = smov 128   ;;  %s2336_s24 = smov 8  }
  0x6e   : > { %1875 = dma.hbm_to_vmem [thread:$0]  (!%p2503_p4), %s2857_s8, 256, %s377_s10, [#allocation14], %s2335_s16, %s2335_s16, %s2336_s24  }
  0x6f   : > { %p1557_p10 = scmp.ge.s32.totalorder %s2325_s19, 2 }
  0x71   : > { %386 = sbr.rel (%p1557_p10) target bundleno = 201 (0xc9), region = 40 }
  0x76   : > { %389 = sbr.rel (!%p2458_p7) target bundleno = 147 (0x93), region = 44  ;;  %s390_s3 = sand.u32 (%p2458_p7), 1, %s2321_s18  }
  0x77   : > { %s1559_s13 = sshll.u32 (%p2458_p7), %s2449_s23, 2  ;;  %s1558_s28 = sshll.u32 (%p2458_p7), %s390_s3, 3 }
  0x78   : > { %s398_s29 = ssub.s32 (%p2458_p7), 1, %s1559_s13  ;;  %s2592_s11 = scalar_lea.sflag (%p2458_p7), [#allocation3], %s390_s3 }
  0x79   : > { %s2589_s21 = sshll.u32 (%p2458_p7), %s398_s29, 5  ;;  %s394_s10 = scalar_lea.vmem (%p2458_p7), [#allocation2], %s1558_s28 }
  0x7a   : > { %s401_s25 = ssub.s32 (%p2458_p7), 128, %s2589_s21 }
  0x7b   : > { %402 = vsyncadd %s2592_s11, %s401_s25  ;;  %p1561_p4 = scmp.ne.s32.totalorder %s2589_s21, 0  ;;  %s1642_s16 = sshll.u32 %s2449_s23, 7 }
  0x7c   : > { %s2600_s9 = scalar_lea.hbm %s2849_s0, %s1642_s16  ;;  %s407_s13 = sshll.u32 %s394_s10, 4  ;;  %s2602_s13 = int_to_ptr.vmem [resolvable:$true] %s407_s13 }
  0x7d   : > { %s2169_s3 = scalar_lea.hbm %s2600_s9, %s2589_s21  ;;  %s2173_s25 = scalar_lea.hbm %s2849_s0, 32 }
  0x7e   : > { %p2170_p6 = scmp.ne.s32.totalorder %s2600_s9, %s2169_s3  ;;  %p2174_p13 = scmp.lt.s32.totalorder %s2600_s9, %s2849_s0 }
  0x7f   : > { %p2175_p0 = scmp.lt.s32.totalorder %s2173_s25, %s2169_s3 }
  0x80   : > { %p2171_p11 = pnand %p2170_p6, %p1561_p4 }
  0x81   : > { %p2176_p8 = por %p2175_p0, %p2174_p13 }
  0x82   : > { %p2172_p5 = pneg %p2171_p11 }
  0x84   : > { %p2177_p2 = pnand %p2176_p8, %p2172_p5 }
  0x86   : > { %2180 = shalt.err (!%p2177_p2)
}
  0x87   : > { %s2181_s10 = scalar_lea.vmem %s2602_s13, %s2589_s21  ;;  %s2337_s16 = smov [#allocation2]  }
  0x88   : > { %p2182_p1 = scmp.ne.s32.totalorder %s2602_s13, %s2181_s10  ;;  %s2185_s24 = sshll.u32 %s2337_s16, 4  ;;  %s2186_s24 = int_to_ptr.vmem [resolvable:$false] %s2185_s24 }
  0x89   : > { %s2187_s30 = scalar_lea.vmem %s2186_s24, 256  ;;  %p2188_p10 = scmp.lt.s32.totalorder %s2602_s13, %s2186_s24 }
  0x8a   : > { %p2183_p3 = pnand %p2182_p1, %p1561_p4  ;;  %p2189_p6 = scmp.lt.s32.totalorder %s2187_s30, %s2181_s10 }
  0x8c   : > { %p2184_p9 = pneg %p2183_p3  ;;  %p2190_p11 = por %p2189_p6, %p2188_p10 }
  0x8e   : > { %p2191_p13 = pnand %p2190_p11, %p2184_p9 }
  0x90   : > { %2194 = shalt.err (!%p2191_p13)
}
  0x91   : > { %s2338_s4 = smov 32   ;;  %s2339_s5 = smov 2  }
  0x92   : > { %413 = dma.hbm_to_vmem [thread:$0]  (%p1561_p4), %s2600_s9, %s2589_s21, %s2602_s13, %s2592_s11, %s2338_s4, %s2338_s4, %s2339_s5  }
  0x93 PF: > { %416 = sbr.rel (!%p2458_p7) target bundleno = 176 (0xb0), region = 48  ;;  %s417_s3 = sand.u32 (%p2458_p7), 1, %s2325_s19  }
  0x94   : > { %s419_s28 = sand.u32 (%p2458_p7), 1, %s2321_s18   ;;  %s1566_s25 = sshll.u32 (%p2458_p7), %s2449_s23, 2 }
  0x95   : > { %s1565_s29 = sshll.u32 (%p2458_p7), %s419_s28, 3  ;;  %s425_s10 = ssub.s32 (%p2458_p7), 1, %s1566_s25 }
  0x96   : > { %s2633_s16 = sshll.u32 (%p2458_p7), %s425_s10, 5  ;;  %s2636_s30 = scalar_lea.sflag (%p2458_p7), [#allocation5], %s417_s3 }
  0x97   : > { %s428_s24 = ssub.s32 (%p2458_p7), 128, %s2633_s16  ;;  %s421_s21 = scalar_lea.vmem (%p2458_p7), [#allocation4], %s1565_s29 }
  0x98   : > { %429 = vsyncadd %s2636_s30, %s428_s24  ;;  %p1568_p7 = scmp.ne.s32.totalorder %s2633_s16, 0  ;;  %s1643_s26 = sshll.u32 %s2449_s23, 7 }
  0x99   : > { %s2644_s13 = scalar_lea.hbm %s2850_s1, %s1643_s26  ;;  %s434_s4 = sshll.u32 %s421_s21, 4  ;;  %s2646_s4 = int_to_ptr.vmem [resolvable:$true] %s434_s4 }
  0x9a   : > { %s2195_s5 = scalar_lea.hbm %s2644_s13, %s2633_s16  ;;  %s2199_s23 = scalar_lea.hbm %s2850_s1, 32 }
  0x9b   : > { %p2196_p4 = scmp.ne.s32.totalorder %s2644_s13, %s2195_s5  ;;  %p2200_p8 = scmp.lt.s32.totalorder %s2644_s13, %s2850_s1 }
  0x9c   : > { %p2201_p2 = scmp.lt.s32.totalorder %s2199_s23, %s2195_s5 }
  0x9d   : > { %p2197_p5 = pnand %p2196_p4, %p1568_p7 }
  0x9e   : > { %p2202_p1 = por %p2201_p2, %p2200_p8 }
  0x9f   : > { %p2198_p0 = pneg %p2197_p5 }
  0xa1   : > { %p2203_p3 = pnand %p2202_p1, %p2198_p0 }
  0xa3   : > { %2206 = shalt.err (!%p2203_p3)
}
  0xa4   : > { %s2207_s10 = scalar_lea.vmem %s2646_s4, %s2633_s16  ;;  %s2340_s24 = smov [#allocation4]  }
  0xa5   : > { %p2208_p9 = scmp.ne.s32.totalorder %s2646_s4, %s2207_s10  ;;  %s2211_s21 = sshll.u32 %s2340_s24, 4  ;;  %s2212_s21 = int_to_ptr.vmem [resolvable:$false] %s2211_s21 }
  0xa6   : > { %s2213_s26 = scalar_lea.vmem %s2212_s21, 256  ;;  %p2214_p11 = scmp.lt.s32.totalorder %s2646_s4, %s2212_s21 }
  0xa7   : > { %p2209_p10 = pnand %p2208_p9, %p1568_p7  ;;  %p2215_p13 = scmp.lt.s32.totalorder %s2213_s26, %s2207_s10 }
  0xa9   : > { %p2210_p6 = pneg %p2209_p10  ;;  %p2216_p4 = por %p2215_p13, %p2214_p11 }
  0xab   : > { %p2217_p5 = pnand %p2216_p4, %p2210_p6 }
  0xad   : > { %2220 = shalt.err (!%p2217_p5)
}
  0xae   : > { %s2341_s11 = smov 32   ;;  %s2342_s9 = smov 2  }
  0xaf   : > { %440 = dma.hbm_to_vmem [thread:$0]  (%p1568_p7), %s2644_s13, %s2633_s16, %s2646_s4, %s2636_s30, %s2341_s11, %s2341_s11, %s2342_s9  }
  0xb0 PF: > { %s444_s5 = sand.u32 1, %s2325_s19   ;;  %s446_s3 = sand.u32 1, %s2309_s15  }
  0xb1   : > { %s1572_s28 = sshll.u32 %s446_s3, 3  ;;  %s1573_s23 = sshll.u32 %s2325_s19, 7 }
  0xb2   : > { %s2678_s10 = scalar_lea.hbm %s2851_s2, %s1573_s23  ;;  %s448_s24 = scalar_lea.vmem [#allocation6], %s1572_s28 }
  0xb3   : > { %s455_s21 = sshll.u32 %s448_s24, 4  ;;  %s445_s16 = scalar_lea.sflag [#allocation5], %s444_s5  ;;  %s456_s21 = int_to_ptr.vmem [resolvable:$true] %s455_s21 }
  0xb4   : > { %s2221_s30 = scalar_lea.hbm %s2678_s10, 128  ;;  %s2225_s19 = scalar_lea.hbm %s2851_s2, 256 }
  0xb5   : > { %p2222_p7 = scmp.ne.s32.totalorder %s2678_s10, %s2221_s30  ;;  %p2226_p2 = scmp.lt.s32.totalorder %s2678_s10, %s2851_s2 }
  0xb6   : > { %p2227_p1 = scmp.lt.s32.totalorder %s2225_s19, %s2221_s30 }
  0xb7   : > { %p2223_p0 = pnand %p2222_p7, %p2483_p12 }
  0xb8   : > { %p2228_p3 = por %p2227_p1, %p2226_p2 }
  0xb9   : > { %p2224_p8 = pneg %p2223_p0 }
  0xbb   : > { %p2229_p9 = pnand %p2228_p3, %p2224_p8 }
  0xbd   : > { %2232 = shalt.err (!%p2229_p9)
}
  0xbe   : > { %s2233_s9 = scalar_lea.vmem %s456_s21, 128  ;;  %s2343_s5 = smov [#allocation6]  }
  0xbf   : > { %p2234_p10 = scmp.ne.s32.totalorder %s456_s21, %s2233_s9  ;;  %s2237_s3 = sshll.u32 %s2343_s5, 4  ;;  %s2238_s3 = int_to_ptr.vmem [resolvable:$false] %s2237_s3 }
  0xc0   : > { %s2239_s28 = scalar_lea.vmem %s2238_s3, 256  ;;  %p2240_p13 = scmp.lt.s32.totalorder %s456_s21, %s2238_s3 }
  0xc1   : > { %p2235_p6 = pnand %p2234_p10, %p2483_p12  ;;  %p2241_p4 = scmp.lt.s32.totalorder %s2239_s28, %s2233_s9 }
  0xc3   : > { %p2236_p11 = pneg %p2235_p6  ;;  %p2242_p5 = por %p2241_p4, %p2240_p13 }
  0xc5   : > { %p2243_p7 = pnand %p2242_p5, %p2236_p11 }
  0xc7   : > { %2246 = shalt.err (!%p2243_p7)
}
  0xc8   : > { %1841 = dma.hbm_to_vmem [thread:$0]  (%p2483_p12), %s2678_s10, 128, %s456_s21, %s445_s16  }
  0xc9 PF: > { %p2887_p0 = scmp.ne.s32.totalorder %s2881_s22, 0 }
  0xca   : > { %s466_s23 = sand.u32 (!%p2887_p0), 1, %s2317_s17   ;;  %p2888_p8 = scmp.ne.s32.totalorder (!%p2887_p0), %s2875_s27, 0 }
  0xcb   : > { %464 = sbr.rel (%p2887_p0) target bundleno = 1800 (0x708), region = 56  ;;  %s2699_s29 = sshll.u32 (!%p2887_p0), %s466_s23, 3 }
  0xcc   : > { %s467_s25 = scalar_lea.sflag (!%p2887_p0), [#allocation3], %s466_s23  ;;  %s470_s24 = scalar_lea.vmem (!%p2887_p0), [#allocation2], %s2699_s29 }
  0xd0   : > { %2276 = dma.done.wait (%p2888_p8), %s467_s25, 128  }
  0xd1   : > { %2278 = vsyncadd (%p2888_p8), %s467_s25, 4294967168  ;;  %s475_s12 = sand.u32 1, %s2438_s20   ;;  %s479_s22 = scalar_lea.vmem [#allocation4], %s2699_s29 }
  0xd2   : > { %s476_s10 = scalar_lea.sflag [#allocation5], %s475_s12 }
  0xd3   : > { %2280 = dma.done.wait (%p2888_p8), %s476_s10, 128  }
  0xd4   : > { %2282 = vsyncadd (%p2888_p8), %s476_s10, 4294967168  ;;  %s2889_s21 = sld [smem:[#allocation25_spill]]  ;;  %s486_s16 = sand.u32 1, %s2305_s14  }
  0xd5   : > { %s2713_s30 = sshll.u32 %s486_s16, 3 }
  0xd6   : > { %s488_s13 = scalar_lea.vmem [#allocation6], %s2713_s30 }
  0xda   : > { %p2890_p12 = scmp.ne.s32.totalorder %s2889_s21, 0 }
  0xdc   : > { %2284 = dma.done.wait (%p2890_p12), %s476_s10, 128  }
  0xdd   : > { %2286 = vsyncadd (%p2890_p12), %s476_s10, 4294967168  ;;  %p2891_p2 = scmp.eq.s32.totalorder %s2438_s20, 0 }
  0xdf   : > { %2288 = dma.done.wait (%p2891_p2), [#allocation8], 1280   ;;  %p2892_p1 = pmov %p2891_p2 }
  0xe1   : > { %2290 = vsyncadd (%p2892_p1), [#allocation8], 4294966016  ;;  %p2893_p3 = pmov %p2892_p1 }
  0xe2   : > { %p2894_p9 = pmov %p2892_p1 }
  0xe3   : > { %2292 = dma.done.wait (%p2893_p3), [#allocation11], 4096  }
  0xe4   : > { %2294 = vsyncadd (%p2894_p9), [#allocation11], 4294963200  ;;  %p2895_p10 = pmov %p2892_p1 }
  0xe5   : > { %p2896_p6 = pmov %p2892_p1 }
  0xe6   : > { %2296 = dma.done.wait (%p2895_p10), [#allocation14], 1280  }
  0xe7   : > { %2298 = vsyncadd (%p2896_p6), [#allocation14], 4294966016  ;;  %p572_p11 = scmp.lt.s32.totalorder %s2438_s20, 1  ;;  %s1586_s27 = sshll.u32 %s2438_s20, 3  ;;  %v2745_v0 = vld [vmem:[#allocation15] sm:$0xff]  ;;  %v2747_v1 = vld [vmem:[#allocation15 + $0x8] sm:$0xff] }
  0xe8   : > { %s2897_s9 = sld [smem:[#allocation29_spill]]  ;;  %p1587_p13 = scmp.ge.s32.totalorder %s1586_s27, 2 }
  0xe9   : > { %s573_s4 = scalar_select %p572_p11, %s2438_s20, 1 }
  0xea   : > { %s2898_s23 = sld [smem:[#allocation30_spill]] }
  0xeb   : > { %s1584_s19 = sshll.u32 %s573_s4, 3 }
  0xec   : > { %587 = sbr.rel (%p1587_p13) target bundleno = 1217 (0x4c1), region = 96 }
  0xee   : > { %s2738_s5 = scalar_lea.vmem %s2897_s9, %s1584_s19 }
  0xf0   : > { %s2743_s25 = scalar_lea.vmem %s2898_s23, %s1584_s19 }
  0xf1   : > { %v1963_v2 = vld [vmem:[#allocation9 + $0x38] sm:$0xff]   ;;  %v2344_v3 = vmov 0.0   ;;  %v1964_v4 = vld [vmem:[#allocation9 + $0x30] sm:$0xff]   ;;  %vm2345_vm0 = vmmov 0   ;;  %v1965_v6 = vld [vmem:[#allocation9 + $0x28] sm:$0xff]   ;;  %vm712_vm1 = vcmask 261120   ;;  %v756_v34 = vlaneseq }
  0xf2   : > { %1701 = vmatprep.subr.bf16.mxu0 %v2344_v3  ;;  %1721 = vmatprep.subr.bf16.mxu1 %v2344_v3  ;;  %v1968_v5 = vld [vmem:[#allocation7 + $0x8] sm:$0xff]   ;;  %v1970_v7 = vld [vmem:[#allocation7] sm:$0xff]   ;;  %v588_v8 = vld [vmem:[%s470_s24] sm:$0xff]  ;;  %vm1106_vm2 = vcmask 7168  }
  0xf3   : > { %1702 = vmatpush3.bf16.msra.mxu0 %v1963_v2  ;;  %1725 = vmatprep.mubr.msk.bf16.mxu1 %vm2345_vm0, %v2344_v3  ;;  %v1966_v9 = vld [vmem:[#allocation9 + $0x20] sm:$0xff]   ;;  %v589_v10 = vpack.c.bf16 %v588_v8, %v588_v8  ;;  %v1973_v11 = vld [vmem:[#allocation10 + $0x38] sm:$0xff]   ;;  %v1974_v13 = vld [vmem:[#allocation10 + $0x30] sm:$0xff]   ;;  %v2789_v36 = vshrl.u32 %v756_v34, 7 }
  0xf4   : > { %1703 = vmatprep.subr.bf16.mxu0 %v2344_v3  ;;  %1717 = vmatprep.mubr.msk.bf16.mxu0 %vm2345_vm0, %v2344_v3  ;;  %v1967_v12 = vld [vmem:[#allocation9 + $0x18] sm:$0xff]   ;;  %v1969_v14 = vld [vmem:[#allocation9 + $0x10] sm:$0xff]   ;;  %v1975_v15 = vld [vmem:[#allocation10 + $0x28] sm:$0xff]  }
  0xf5   : > { %1722 = vmatpush3.bf16.msra.mxu1 %v1968_v5  ;;  %v1971_v16 = vld [vmem:[#allocation9 + $0x8] sm:$0xff]   ;;  %v1976_v17 = vld [vmem:[#allocation10 + $0x20] sm:$0xff]   ;;  %v594_v19 = vld [vmem:[%s479_s22] sm:$0xff]  ;;  %v758_v37 = vsub.s32 0, %v2789_v36  ;;  %v812_v54 = vsub.s32 1, %v2789_v36  ;;  %v907_v5 = vsub.s32 2, %v2789_v36 }
  0xf6   : > { %1723 = vmatprep.subr.bf16.mxu1 %v2344_v3  ;;  %v1972_v18 = vld [vmem:[#allocation9] sm:$0xff]   ;;  %v1977_v20 = vld [vmem:[#allocation10 + $0x18] sm:$0xff]   ;;  %v595_v21 = vpack.c.bf16 %v594_v19, %v594_v19  ;;  %v1978_v22 = vld [vmem:[#allocation10 + $0x10] sm:$0xff]  }
  0xf7   : > { %1704 = vmatpush3.bf16.msra.mxu0 %v1964_v4  ;;  %v1979_v23 = vld [vmem:[#allocation10 + $0x8] sm:$0xff]   ;;  %v1980_v24 = vld [vmem:[#allocation10] sm:$0xff]   ;;  %v1981_v25 = vld [vmem:[#allocation10 + $0x78] sm:$0xff]   ;;  %v759_v38 = vrot.slane %v2745_v0, %v758_v37  ;;  %v813_v55 = vrot.slane %v2745_v0, %v812_v54 }
  0xf8   : > { %1705 = vmatprep.subr.bf16.mxu0 %v2344_v3  ;;  %v1982_v26 = vld [vmem:[#allocation10 + $0x70] sm:$0xff]   ;;  %v1983_v27 = vld [vmem:[#allocation10 + $0x68] sm:$0xff]   ;;  %v1984_v28 = vld [vmem:[#allocation10 + $0x60] sm:$0xff]  }
  0xf9   : > { %1724 = vmatpush3.bf16.msra.mxu1 %v1970_v7  ;;  %v1985_v29 = vld [vmem:[#allocation10 + $0x58] sm:$0xff]   ;;  %v1986_v30 = vld [vmem:[#allocation10 + $0x50] sm:$0xff]   ;;  %v1987_v46 = vld [vmem:[#allocation10 + $0x48] sm:$0xff]  }
  0xfa   : > { %1729 = vmatprep.subr.bf16.mxu1 %v2344_v3  ;;  %v1988_v47 = vld [vmem:[#allocation10 + $0x40] sm:$0xff]   ;;  %v1989_v48 = vld [vmem:[#allocation10 + $0xb8] sm:$0xff]   ;;  %v1990_v49 = vld [vmem:[#allocation10 + $0xb0] sm:$0xff]  }
  0xfb   : > { %1706 = vmatpush3.bf16.msra.mxu0 %v1965_v6  ;;  %v1991_v50 = vld [vmem:[#allocation10 + $0xa8] sm:$0xff]   ;;  %v1992_v51 = vld [vmem:[#allocation10 + $0xa0] sm:$0xff]   ;;  %v1993_v52 = vld [vmem:[#allocation10 + $0x98] sm:$0xff]   ;;  %v908_v6 = vrot.slane %v2745_v0, %v907_v5 }
  0xfc   : > { %1707 = vmatprep.subr.bf16.mxu0 %v2344_v3  ;;  %1726 = vmatmul.mubr.msk.bf16.vlgmr.msra.gmra.mxu1 %vm712_vm1, %v589_v10  ;;  %v1994_v53 = vld [vmem:[#allocation10 + $0x90] sm:$0xff]   ;;  %v1995_v2 = vld [vmem:[#allocation10 + $0x88] sm:$0xff]   ;;  %v1996_v4 = vld [vmem:[#allocation10 + $0x80] sm:$0xff]  }
  0xfd   : > { %1730 = vmatpush3.bf16.msra.mxu1 %v1973_v11  ;;  %1745 = vmatprep.mubr.msk.bf16.mxu1 %vm2345_vm0, %v2344_v3 }
  0xfe   : > { %1731 = vmatprep.subr.bf16.mxu1 %v2344_v3 }
  0xff   : > { %1708 = vmatpush3.bf16.msra.mxu0 %v1966_v9 }
 0x100   : > { %1709 = vmatprep.subr.bf16.mxu0 %v2344_v3 }
 0x101   : > { %1732 = vmatpush3.bf16.msra.mxu1 %v1974_v13 }
 0x102   : > { %1733 = vmatprep.subr.bf16.mxu1 %v2344_v3 }
 0x103   : > { %1710 = vmatpush3.bf16.msra.mxu0 %v1967_v12 }
 0x104   : > { %1711 = vmatprep.subr.bf16.mxu0 %v2344_v3 }
 0x105   : > { %1734 = vmatpush3.bf16.msra.mxu1 %v1975_v15  ;;  %v1002_v15 = vsub.s32 3, %v2789_v36 }
 0x106   : > { %1735 = vmatprep.subr.bf16.mxu1 %v2344_v3 }
 0x107   : > { %1712 = vmatpush3.bf16.msra.mxu0 %v1969_v14 }
 0x108   : > { %1713 = vmatprep.subr.bf16.mxu0 %v2344_v3 }
 0x109   : > { %1736 = vmatpush3.bf16.msra.mxu1 %v1976_v17 }
 0x10a   : > { %1737 = vmatprep.subr.bf16.mxu1 %v2344_v3 }
 0x10b   : > { %1714 = vmatpush3.bf16.msra.mxu0 %v1971_v16  ;;  %v1003_v16 = vrot.slane %v2745_v0, %v1002_v15 }
 0x10c   : > { %1715 = vmatprep.subr.bf16.mxu0 %v2344_v3 }
 0x10d   : > { %1738 = vmatpush3.bf16.msra.mxu1 %v1977_v20 }
 0x10e   : > { %1739 = vmatprep.subr.bf16.mxu1 %v2344_v3 }
 0x10f   : > { %1716 = vmatpush3.bf16.msra.mxu0 %v1972_v18 }
 0x110   : > { %1749 = vmatprep.subr.bf16.mxu0 %v2344_v3 }
 0x111   : > { %1740 = vmatpush3.bf16.msra.mxu1 %v1978_v22 }
 0x112   : > { %1718 = vmatmul.mubr.bf16.vlgmr.msra.gmra.mxu0 %v595_v21  ;;  %1741 = vmatprep.subr.bf16.mxu1 %v2344_v3 }
 0x113   : > { %1765 = vmatprep.mubr.msk.bf16.mxu0 %vm2345_vm0, %v2344_v3  ;;  %1750 = vmatpush3.bf16.msra.mxu0 %v1981_v25 }
 0x114   : > { %1751 = vmatprep.subr.bf16.mxu0 %v2344_v3 }
 0x115   : > { %1742 = vmatpush3.bf16.msra.mxu1 %v1979_v23 }
 0x116   : > { %1743 = vmatprep.subr.bf16.mxu1 %v2344_v3 }
 0x117   : > { %1752 = vmatpush3.bf16.msra.mxu0 %v1982_v26  ;;  %v1104_v26 = vrot.slane %v2747_v1, %v758_v37 }
 0x118   : > { %1753 = vmatprep.subr.bf16.mxu0 %v2344_v3 }
 0x119   : > { %1744 = vmatpush3.bf16.msra.mxu1 %v1980_v24 }
 0x11a   : > { %1769 = vmatprep.subr.bf16.mxu1 %v2344_v3 }
 0x11b   : > { %1754 = vmatpush3.bf16.msra.mxu0 %v1983_v27 }
 0x11c   : > { %1755 = vmatprep.subr.bf16.mxu0 %v2344_v3 }
 0x11f   : > { %1756 = vmatpush3.bf16.msra.mxu0 %v1984_v28 }
 0x120   : > { %1757 = vmatprep.subr.bf16.mxu0 %v2344_v3 }
 0x123   : > { %1758 = vmatpush3.bf16.msra.mxu0 %v1985_v29 }
 0x124   : > { %1759 = vmatprep.subr.bf16.mxu0 %v2344_v3 }
 0x127   : > { %1760 = vmatpush3.bf16.msra.mxu0 %v1986_v30 }
 0x128   : > { %1761 = vmatprep.subr.bf16.mxu0 %v2344_v3 }
 0x12b   : > { %1762 = vmatpush3.bf16.msra.mxu0 %v1987_v46 }
 0x12c   : > { %1763 = vmatprep.subr.bf16.mxu0 %v2344_v3 }
 0x12f   : > { %1764 = vmatpush3.bf16.msra.mxu0 %v1988_v47 }
 0x1bc   : > { %v750_v31 = vpop.f32.mrf.mxu1 }
 0x1be   : > { %v1727_v32 = vpop.f32.mrf.mxu1 }
 0x1c0   : > { %v753_v33 = vpop.f32.mrf.mxu1 }
 0x1c2   : > { %v1728_v35 = vpop.f32.mrf.mxu1 }
 0x1d2   : > { %v694_v39 = vpop.f32.mrf.mxu0 }
 0x1d3   : > { %v751_v40 = vadd.f32 %v750_v31, %v694_v39 }
 0x1d4   : > { %v1719_v41 = vpop.f32.mrf.mxu0 }
 0x1d5   : > { %v760_v42 = vadd.f32 %v759_v38, %v751_v40 }
 0x1d6   : > { %v697_v43 = vpop.f32.mrf.mxu0 }
 0x1d7   : > { %v809_v44 = vpack.c.bf16 %v760_v42, %v760_v42 }
 0x1d8   : > { %v1720_v45 = vpop.f32.mrf.mxu0 }
 0x1d9   : > { %1746 = vmatmul.mubr.bf16.vlgmr.msra.gmra.mxu1 %v809_v44 }
 0x1da   : > { %1785 = vmatprep.mubr.msk.bf16.mxu1 %vm2345_vm0, %v2344_v3  ;;  %1770 = vmatpush3.bf16.msra.mxu1 %v1989_v48 }
 0x1db   : > { %1771 = vmatprep.subr.bf16.mxu1 %v2344_v3 }
 0x1de   : > { %1772 = vmatpush3.bf16.msra.mxu1 %v1990_v49 }
 0x1df   : > { %1773 = vmatprep.subr.bf16.mxu1 %v2344_v3 }
 0x1e2   : > { %1774 = vmatpush3.bf16.msra.mxu1 %v1991_v50 }
 0x1e3   : > { %1775 = vmatprep.subr.bf16.mxu1 %v2344_v3 }
 0x1e6   : > { %1776 = vmatpush3.bf16.msra.mxu1 %v1992_v51 }
 0x1e7   : > { %1777 = vmatprep.subr.bf16.mxu1 %v2344_v3 }
 0x1ea   : > { %1778 = vmatpush3.bf16.msra.mxu1 %v1993_v52 }
 0x1eb   : > { %1779 = vmatprep.subr.bf16.mxu1 %v2344_v3 }
 0x1ee   : > { %1780 = vmatpush3.bf16.msra.mxu1 %v1994_v53 }
 0x1ef   : > { %1781 = vmatprep.subr.bf16.mxu1 %v2344_v3 }
 0x1f2   : > { %1782 = vmatpush3.bf16.msra.mxu1 %v1995_v2 }
 0x1f3   : > { %1783 = vmatprep.subr.bf16.mxu1 %v2344_v3  ;;  %v1096_v3 = vsub.s32 6, %v2789_v36 }
 0x1f5   : > { %v1097_v21 = vrot.slane %v2745_v0, %v1096_v3 }
 0x1f6   : > { %1784 = vmatpush3.bf16.msra.mxu1 %v1996_v4 }
 0x299   : > { %v896_v56 = vpop.f32.mrf.mxu1 }
 0x29a   : > { %v897_v57 = vadd.f32 %v896_v56, %v813_v55 }
 0x29b   : > { %v1747_v58 = vpop.f32.mrf.mxu1 }
 0x29c   : > { %v902_v59 = vmax.f32 %v897_v57, 0.0 }
 0x29d   : > { %v899_v60 = vpop.f32.mrf.mxu1 }
 0x29e   : > { %v903_v61 = vadd.f32 %v902_v59, %v760_v42 }
 0x29f   : > { %v1748_v62 = vpop.f32.mrf.mxu1 }
 0x2a0   : > { %v904_v63 = vpack.c.bf16 %v903_v61, %v903_v61 }
 0x2a2   : > { %1766 = vmatmul.mubr.bf16.vlgmr.msra.gmra.mxu0 %v904_v63 }
 0x362   : > { %v991_v7 = vpop.f32.mrf.mxu0 }
 0x363   : > { %v992_v8 = vadd.f32 %v991_v7, %v908_v6 }
 0x364   : > { %v1767_v9 = vpop.f32.mrf.mxu0 }
 0x365   : > { %v997_v10 = vmax.f32 %v992_v8, 0.0 }
 0x366   : > { %v994_v11 = vpop.f32.mrf.mxu0 }
 0x367   : > { %v998_v12 = vadd.f32 %v997_v10, %v903_v61 }
 0x368   : > { %v1768_v13 = vpop.f32.mrf.mxu0 }
 0x369   : > { %v999_v14 = vpack.c.bf16 %v998_v12, %v998_v12 }
 0x36b   : > { %1786 = vmatmul.mubr.bf16.vlgmr.msra.gmra.mxu1 %v999_v14 }
 0x42b   : > { %v1086_v17 = vpop.f32.mrf.mxu1 }
 0x42c   : > { %v1087_v18 = vadd.f32 %v1086_v17, %v1003_v16 }
 0x42d   : > { %v1787_v19 = vpop.f32.mrf.mxu1 }
 0x42e   : > { %v1092_v20 = vmax.f32 %v1087_v18, 0.0 }
 0x42f   : > { %v1089_v22 = vpop.f32.mrf.mxu1 }
 0x430   : > { %v1093_v23 = vadd.f32 %v1092_v20, %v998_v12 }
 0x431   : > { %v1788_v24 = vpop.f32.mrf.mxu1 }
 0x432   : > { %v1098_v25 = vmul.f32 %v1097_v21, %v1093_v23 }
 0x434   : > { %1099 = vadd.xlane.f32.xlu0 %v1098_v25 }
 0x4bd   : > { %v1100_v27 = vpop.xlane.xlu0 %1099 }
 0x4be   : > { %v1105_v28 = vadd.f32 %v1104_v26, %v1100_v27 }
 0x4c0   : > { %1107 = vst.msk [vmem:[%s2738_s5] sm:$0xff] %vm1106_vm2, %v1105_v28 }
 0x4c1 PF: > { %p1623_p4 = scmp.lt.s32.totalorder %s1586_s27, 2 }
 0x4c3   : > { %1111 = sbr.rel (%p1623_p4) target bundleno = 1226 (0x4ca), region = 100 }
 0x4c8   : > { %vm1112_vm3 = vcmask 7168   ;;  %v2346_v29 = vmov 0.0  }
 0x4c9   : > { %1113 = vst.msk [vmem:[%s2738_s5] sm:$0xff] %vm1112_vm3, %v2346_v29 }
 0x4ca PF: > { %v1997_v30 = vld [vmem:[#allocation12 + $0x38] sm:$0xff]   ;;  %v2347_v31 = vmov 0.0   ;;  %v1998_v32 = vld [vmem:[#allocation12 + $0x30] sm:$0xff]   ;;  %vm2348_vm4 = vmmov 0   ;;  %v1999_v33 = vld [vmem:[#allocation12 + $0x28] sm:$0xff]   ;;  %v1132_v49 = vlaneseq  ;;  %vm1351_vm7 = vcmask 7168  }
 0x4cb   : > { %1789 = vmatprep.subr.bf16.mxu0 %v2347_v31  ;;  %1809 = vmatprep.subr.bf16.mxu1 %v2347_v31  ;;  %v2005_v34 = vld [vmem:[#allocation13 + $0x38] sm:$0xff]   ;;  %v2000_v35 = vld [vmem:[#allocation12 + $0x20] sm:$0xff]   ;;  %v2006_v36 = vld [vmem:[#allocation13 + $0x30] sm:$0xff]  }
 0x4cc   : > { %1790 = vmatpush3.bf16.msra.mxu0 %v1997_v30  ;;  %1805 = vmatprep.mubr.msk.bf16.mxu0 %vm2348_vm4, %v2347_v31  ;;  %v2001_v37 = vld [vmem:[#allocation12 + $0x18] sm:$0xff]   ;;  %v2007_v38 = vld [vmem:[#allocation13 + $0x28] sm:$0xff]   ;;  %v2002_v39 = vld [vmem:[#allocation12 + $0x10] sm:$0xff]   ;;  %v1133_v50 = vshrl.u32 %v1132_v49, 7 }
 0x4cd   : > { %1791 = vmatprep.subr.bf16.mxu0 %v2347_v31  ;;  %1825 = vmatprep.mubr.msk.bf16.mxu1 %vm2348_vm4, %v2347_v31  ;;  %v2008_v40 = vld [vmem:[#allocation13 + $0x20] sm:$0xff]   ;;  %v2003_v41 = vld [vmem:[#allocation12 + $0x8] sm:$0xff]   ;;  %v2009_v42 = vld [vmem:[#allocation13 + $0x18] sm:$0xff]  }
 0x4ce   : > { %1810 = vmatpush3.bf16.msra.mxu1 %v2005_v34  ;;  %v2004_v43 = vld [vmem:[#allocation12] sm:$0xff]   ;;  %v2010_v45 = vld [vmem:[#allocation13 + $0x10] sm:$0xff]   ;;  %v2011_v47 = vld [vmem:[#allocation13 + $0x8] sm:$0xff]   ;;  %v1134_v51 = vsub.s32 4, %v1133_v50  ;;  %v1246_v61 = vsub.s32 5, %v1133_v50  ;;  %v1341_v63 = vsub.s32 7, %v1133_v50 }
 0x4cf   : > { %1811 = vmatprep.subr.bf16.mxu1 %v2347_v31  ;;  %v1114_v44 = vld [vmem:[%s488_s13] sm:$0xff]  ;;  %v1348_v12 = vsub.s32 1, %v1133_v50 }
 0x4d0   : > { %1792 = vmatpush3.bf16.msra.mxu0 %v1998_v32  ;;  %v1115_v46 = vpack.c.bf16 %v1114_v44, %v1114_v44  ;;  %v2012_v48 = vld [vmem:[#allocation13] sm:$0xff]   ;;  %v1135_v52 = vrot.slane %v2745_v0, %v1134_v51  ;;  %v1247_v62 = vrot.slane %v2745_v0, %v1246_v61  ;;  %v1342_v6 = vrot.slane %v2745_v0, %v1341_v63 }
 0x4d1   : > { %1793 = vmatprep.subr.bf16.mxu0 %v2347_v31  ;;  %v1349_v13 = vrot.slane %v2747_v1, %v1348_v12 }
 0x4d2   : > { %1812 = vmatpush3.bf16.msra.mxu1 %v2006_v36 }
 0x4d3   : > { %1813 = vmatprep.subr.bf16.mxu1 %v2347_v31 }
 0x4d4   : > { %1794 = vmatpush3.bf16.msra.mxu0 %v1999_v33 }
 0x4d5   : > { %1795 = vmatprep.subr.bf16.mxu0 %v2347_v31 }
 0x4d6   : > { %1814 = vmatpush3.bf16.msra.mxu1 %v2007_v38 }
 0x4d7   : > { %1815 = vmatprep.subr.bf16.mxu1 %v2347_v31 }
 0x4d8   : > { %1796 = vmatpush3.bf16.msra.mxu0 %v2000_v35 }
 0x4d9   : > { %1797 = vmatprep.subr.bf16.mxu0 %v2347_v31 }
 0x4da   : > { %1816 = vmatpush3.bf16.msra.mxu1 %v2008_v40 }
 0x4db   : > { %1817 = vmatprep.subr.bf16.mxu1 %v2347_v31 }
 0x4dc   : > { %1798 = vmatpush3.bf16.msra.mxu0 %v2001_v37 }
 0x4dd   : > { %1799 = vmatprep.subr.bf16.mxu0 %v2347_v31 }
 0x4de   : > { %1818 = vmatpush3.bf16.msra.mxu1 %v2009_v42 }
 0x4df   : > { %1819 = vmatprep.subr.bf16.mxu1 %v2347_v31 }
 0x4e0   : > { %1800 = vmatpush3.bf16.msra.mxu0 %v2002_v39 }
 0x4e1   : > { %1801 = vmatprep.subr.bf16.mxu0 %v2347_v31 }
 0x4e2   : > { %1820 = vmatpush3.bf16.msra.mxu1 %v2010_v45 }
 0x4e3   : > { %1821 = vmatprep.subr.bf16.mxu1 %v2347_v31 }
 0x4e4   : > { %1802 = vmatpush3.bf16.msra.mxu0 %v2003_v41 }
 0x4e5   : > { %1803 = vmatprep.subr.bf16.mxu0 %v2347_v31 }
 0x4e6   : > { %1822 = vmatpush3.bf16.msra.mxu1 %v2011_v47 }
 0x4e7   : > { %1823 = vmatprep.subr.bf16.mxu1 %v2347_v31 }
 0x4e8   : > { %1804 = vmatpush3.bf16.msra.mxu0 %v2004_v43 }
 0x4ea   : > { %1824 = vmatpush3.bf16.msra.mxu1 %v2012_v48 }
 0x4eb   : > { %1806 = vmatmul.mubr.bf16.vlgmr.msra.gmra.mxu0 %v1115_v46 }
 0x5ab   : > { %v1218_v53 = vpop.f32.mrf.mxu0 }
 0x5ac   : > { %v1219_v54 = vadd.f32 %v1218_v53, %v1135_v52 }
 0x5ad   : > { %v1807_v55 = vpop.f32.mrf.mxu0 }
 0x5ae   : > { %vm1224_vm5 = vcmp.gt.f32.partialorder %v1219_v54, 0.0  ;;  %v1225_v56 = vmul.f32 0.01, %v1219_v54 }
 0x5af   : > { %v1221_v57 = vpop.f32.mrf.mxu0 }
 0x5b0   : > { %v1226_v58 = vsel %vm1224_vm5, %v1219_v54, %v1225_v56 }
 0x5b1   : > { %v1808_v59 = vpop.f32.mrf.mxu0  ;;  %v1227_v60 = vpack.c.bf16 %v1226_v58, %v1226_v58 }
 0x5b3   : > { %1826 = vmatmul.mubr.bf16.vlgmr.msra.gmra.mxu1 %v1227_v60 }
 0x673   : > { %v1330_v2 = vpop.f32.mrf.mxu1 }
 0x674   : > { %v1331_v4 = vadd.f32 %v1330_v2, %v1247_v62 }
 0x675   : > { %v1827_v5 = vpop.f32.mrf.mxu1 }
 0x676   : > { %v1337_v7 = vmul.f32 0.01, %v1331_v4  ;;  %vm1336_vm6 = vcmp.gt.f32.partialorder %v1331_v4, 0.0 }
 0x677   : > { %v1333_v8 = vpop.f32.mrf.mxu1 }
 0x678   : > { %v1338_v9 = vsel %vm1336_vm6, %v1331_v4, %v1337_v7 }
 0x679   : > { %v1828_v10 = vpop.f32.mrf.mxu1  ;;  %v1343_v11 = vmul.f32 %v1342_v6, %v1338_v9 }
 0x67b   : > { %1344 = vadd.xlane.f32.xlu0 %v1343_v11 }
 0x704   : > { %v1345_v14 = vpop.xlane.xlu0 %1344 }
 0x705   : > { %v1350_v15 = vadd.f32 %v1349_v13, %v1345_v14 }
 0x707   : > { %1352 = vst.msk [vmem:[%s2743_s25] sm:$0xff] %vm1351_vm7, %v1350_v15 }
 0x708 PF: > { %s2899_s19 = sld [smem:[#allocation22_spill]]  ;;  %s2902_s13 = smov %s2305_s14 }
 0x709   : > { %s2900_s20 = sld [smem:[#allocation24_spill]]  ;;  %s2903_s14 = smov %s2309_s15 }
 0x70a   : > { %s2901_s29 = sld [smem:[#allocation23_spill]]  ;;  %s2905_s16 = smov %s2317_s17 }
 0x70b   : > { %s2906_s17 = smov %s2321_s18 }
 0x70e   : > { %p27_p5 = scmp.ge.s32.totalorder %s2899_s19, 4  }
 0x70f   : > { %s2904_s15 = smov %s2900_s20 }
 0x710   : > { %s2907_s18 = smov %s2901_s29  ;;  %29 = sbr.rel (!%p27_p5) target bundleno = 16 (0x10), region = 164 }
 0x715   :  { %1386 = vsyncpa [#allocation3], 1 }
 0x716   :  { %1388 = vsyncpa [#allocation3 + $0x1], 1 }
 0x717   :  { %1389 = vsyncpa [#allocation5], 1 }
 0x718   :  { %1391 = vsyncpa [#allocation5 + $0x1], 1 }
 0x719   :  { %1392 = vsyncpa [#allocation8], 1 }
 0x71a   :  { %1393 = vsyncpa [#allocation11], 1 }
 0x71b   :  { %1394 = vsyncpa [#allocation14], 1 }

</bundles_post_ra>
